<compile_context>
chip_gen: v7x
topology: tpu7x:2x2x1
jax: 0.10.0
libtpu: 0.0.40
codegen_flags: <defaults>
</compile_context>

<pallas_src>
import functools

import jax
import jax.numpy as jnp
from jax.experimental import pallas as pl
from jax.experimental.pallas import tpu as pltpu


def _conservation_kernel(scal_ref, target_ref, aux_ref, out_ref, *,
                         index_disp, index_vel):
    # Lane-dense layout: sublanes = components, lanes = atoms (zero-padded to
    # a multiple of 128; padded atoms have mass 0 so reductions are exact).
    tgt = target_ref[...].astype(jnp.float32)          # [Wp, Np]
    aux = aux_ref[...].astype(jnp.float32)             # [4,  Np] rows 0-2 vel_in, row 3 mass

    total_mass = scal_ref[0]
    pref_vel = scal_ref[1]
    inv_mass = 1.0 / total_mass                        # scalar ops (hoisted)
    inv_pref = 1.0 / pref_vel

    disp = tgt[index_disp:index_disp + 3, :]           # [3, Np]
    vel_pred = tgt[index_vel:index_vel + 3, :]         # [3, Np] (normalized)
    vel_in = aux[0:3, :]                               # [3, Np]
    mass = aux[3:4, :]                                 # [1, Np]

    # Net linear momenta: lane-axis reductions (XLU slot, off the VALU path).
    lin_in = jnp.sum(mass * vel_in, axis=-1, keepdims=True)                 # [3, 1]
    lin_out = pref_vel * jnp.sum(mass * vel_pred, axis=-1, keepdims=True)   # [3, 1]
    vel_adjust = (lin_in - lin_out) * inv_mass                              # [3, 1]

    # Displacement re-centering only when net input momentum is exactly zero
    # (mirrors the torch.all(net_lin_mom_in == 0.0) branch).
    all_zero = jnp.all(lin_in == 0.0)
    disp_adjust = jnp.sum(mass * disp, axis=-1, keepdims=True) * inv_mass   # [3, 1]
    disp_new = disp - jnp.where(all_zero, disp_adjust,
                                jnp.zeros_like(disp_adjust))

    # (vel_pred*pref + vel_adjust)/pref  ==  vel_pred + vel_adjust/pref
    vel_new = vel_pred + vel_adjust * inv_pref

    # Write the aliased slab: copy everything once, then overwrite the disp /
    # vel component rows (full-lane, unmasked stores along the 128-lane axis).
    out_ref[...] = tgt.astype(out_ref.dtype)
    out_ref[pl.ds(index_disp, 3), :] = disp_new.astype(out_ref.dtype)
    out_ref[pl.ds(index_vel, 3), :] = vel_new.astype(out_ref.dtype)


@functools.partial(jax.jit, static_argnames=("index_disp", "index_vel"))
def conservation_layer(target, velocities, masses, total_mass,
                       prefactor_vel=1.0, index_disp=0, index_vel=3):
    """JAX wrapper reproducing ConservationLayer.forward for a single graph.

    target:     [N, W>=6] raw predictions; target[:, index_disp:+3] = displacements,
                target[:, index_vel:+3] = normalized velocities.
    velocities: [N, 3] input velocities.
    masses:     [N] or [N, 1] atomic masses.
    total_mass: scalar total mass.
    """
    n, w = target.shape
    masses = jnp.reshape(masses, (n,)).astype(jnp.float32)
    velocities = jnp.reshape(velocities, (n, 3)).astype(jnp.float32)

    # Lane-dense packing: atoms on the 128-wide lane axis (zero-padded),
    # components on the sublane axis (padded to a multiple of 8).
    pad_n = (-n) % 128
    pad_w = (-w) % 8
    target_t = jnp.pad(jnp.transpose(target), ((0, pad_w), (0, pad_n)))     # [Wp, Np]
    aux = jnp.concatenate([jnp.transpose(velocities), masses[None, :]],
                          axis=0)                                           # [4, N]
    aux = jnp.pad(aux, ((0, 0), (0, pad_n)))                                # [4, Np]

    # 1-D SMEM scalar slab (smallest possible SMEM padding): [total_mass, pref_vel]
    scalars = jnp.stack([jnp.asarray(total_mass, jnp.float32).reshape(()),
                         jnp.asarray(prefactor_vel, jnp.float32).reshape(())])

    vmem = pl.BlockSpec(memory_space=pltpu.MemorySpace.VMEM)
    smem = pl.BlockSpec(memory_space=pltpu.MemorySpace.SMEM)

    kernel = functools.partial(_conservation_kernel,
                               index_disp=index_disp, index_vel=index_vel)

    out_t = pl.pallas_call(
        kernel,
        out_shape=jax.ShapeDtypeStruct(target_t.shape, target.dtype),
        in_specs=[smem, vmem, vmem],
        out_specs=vmem,
        input_output_aliases={1: 0},   # target slab updated in place (HBM alias)
    )(scalars, target_t, aux)

    # Un-pad and transpose back to the original [N, W] layout (fused by jit).
    return jnp.transpose(out_t[:w, :n])


def _reference(target, velocities, masses, total_mass, prefactor_vel):
    """Pure-jnp reference (faithful to the torch forward) for verification."""
    masses = masses.reshape(-1, 1)
    disps = target[:, 0:3]
    vel_out = target[:, 3:6] * prefactor_vel
    lin_in = jnp.sum(masses * velocities, axis=0)
    lin_out = jnp.sum(masses * vel_out, axis=0)
    vel_adjust = (lin_in - lin_out) / total_mass
    disp_adjust = jnp.sum(masses * disps, axis=0) / total_mass
    disps_new = jnp.where(jnp.all(lin_in == 0.0), disps - disp_adjust, disps)
    vel_new = (vel_out + vel_adjust) / prefactor_vel
    out = target.at[:, 0:3].set(disps_new)
    out = out.at[:, 3:6].set(vel_new)
    return out


if __name__ == "__main__":
    key = jax.random.PRNGKey(0)
    k1, k2, k3, k4 = jax.random.split(key, 4)

    n_atoms = 8                       # small synthetic "molecule"
    # target = [displacements(3) | velocities(3)] per atom (raw model output)
    target = jax.random.normal(k1, (n_atoms, 6), dtype=jnp.float32)
    velocities = jax.random.normal(k2, (n_atoms, 3), dtype=jnp.float32)
    masses = jax.random.uniform(k3, (n_atoms, 1), dtype=jnp.float32,
                                minval=1.0, maxval=16.0)
    total_mass = jnp.sum(masses)
    prefactor_vel = 0.5               # deterministic normalization constant

    # Case 1: nonzero net input momentum (displacements untouched).
    out = conservation_layer(target, velocities, masses, total_mass,
                             prefactor_vel=prefactor_vel)
    out = jax.block_until_ready(out)
    ref = _reference(target, velocities, masses, total_mass, prefactor_vel)
    assert out.shape == target.shape and out.dtype == target.dtype
    assert jnp.allclose(out, ref, atol=1e-5, rtol=1e-5), "mismatch vs reference"

    # Case 2: zero net input momentum -> displacement re-centering branch.
    zero_vel = jnp.zeros_like(velocities)
    out2 = conservation_layer(target, zero_vel, masses, total_mass,
                              prefactor_vel=prefactor_vel)
    out2 = jax.block_until_ready(out2)
    ref2 = _reference(target, zero_vel, masses, total_mass, prefactor_vel)
    assert jnp.allclose(out2, ref2, atol=1e-5, rtol=1e-5), "mismatch (zero-momentum branch)"

    # Case 3: non-multiple-of-128 atom count and a wider target (extra columns
    # must pass through unchanged) to exercise the padding paths.
    n3 = 37
    kk1, kk2, kk3 = jax.random.split(k4, 3)
    target3 = jax.random.normal(kk1, (n3, 9), dtype=jnp.float32)
    vel3 = jax.random.normal(kk2, (n3, 3), dtype=jnp.float32)
    m3 = jax.random.uniform(kk3, (n3,), dtype=jnp.float32, minval=1.0, maxval=16.0)
    tm3 = jnp.sum(m3)
    out3 = jax.block_until_ready(
        conservation_layer(target3, vel3, m3, tm3, prefactor_vel=2.0))
    ref3 = _reference(target3, vel3, m3, tm3, 2.0)
    assert jnp.allclose(out3, ref3, atol=1e-5, rtol=1e-5), "mismatch (padded case)"

    print("KERNEL_OK")
</pallas_src>

<mosaic_0001>
module attributes {stable_mosaic.version = 11 : i64} {
  func.func @_conservation_kernel(%arg0: memref<2xf32, #tpu.memory_space<smem>>, %arg1: memref<8x128xf32, #tpu.memory_space<vmem>>, %arg2: memref<4x128xf32, #tpu.memory_space<vmem>>, %arg3: memref<8x128xf32, #tpu.memory_space<vmem>>) attributes {dimension_semantics = [], scalar_prefetch = 0 : i64, scratch_operands = 0 : i64, tpu.core_type = #tpu.core_type<tc>} {
    %c0 = arith.constant 0 : index
    %c0_0 = arith.constant 0 : index
    %0 = vector.load %arg1[%c0, %c0_0] : memref<8x128xf32, #tpu.memory_space<vmem>>, vector<8x128xf32>
    %c0_1 = arith.constant 0 : index
    %c0_2 = arith.constant 0 : index
    %1 = vector.load %arg2[%c0_1, %c0_2] : memref<4x128xf32, #tpu.memory_space<vmem>>, vector<4x128xf32>
    %c0_3 = arith.constant 0 : index
    %2 = memref.load %arg0[%c0_3] : memref<2xf32, #tpu.memory_space<smem>>
    %c1 = arith.constant 1 : index
    %3 = memref.load %arg0[%c1] : memref<2xf32, #tpu.memory_space<smem>>
    %cst = arith.constant 1.000000e+00 : f32
    %4 = arith.divf %cst, %2 : f32
    %cst_4 = arith.constant 1.000000e+00 : f32
    %5 = arith.divf %cst_4, %3 : f32
    %6 = vector.extract_strided_slice %0 {offsets = [0, 0], sizes = [3, 128], strides = [1, 1]} : vector<8x128xf32> to vector<3x128xf32>
    %7 = vector.extract_strided_slice %0 {offsets = [3, 0], sizes = [3, 128], strides = [1, 1]} : vector<8x128xf32> to vector<3x128xf32>
    %8 = vector.extract_strided_slice %1 {offsets = [0, 0], sizes = [3, 128], strides = [1, 1]} : vector<4x128xf32> to vector<3x128xf32>
    %9 = vector.extract_strided_slice %1 {offsets = [3, 0], sizes = [1, 128], strides = [1, 1]} : vector<4x128xf32> to vector<1x128xf32>
    %10 = vector.broadcast %9 : vector<1x128xf32> to vector<3x128xf32>
    %11 = arith.mulf %10, %8 : vector<3x128xf32>
    %cst_5 = arith.constant dense<0.000000e+00> : vector<3xf32>
    %12 = vector.multi_reduction <add>, %11, %cst_5 [1] : vector<3x128xf32> to vector<3xf32>
    %13 = vector.shape_cast %12 : vector<3xf32> to vector<3x1xf32>
    %14 = vector.broadcast %9 : vector<1x128xf32> to vector<3x128xf32>
    %15 = arith.mulf %14, %7 : vector<3x128xf32>
    %cst_6 = arith.constant dense<0.000000e+00> : vector<3xf32>
    %16 = vector.multi_reduction <add>, %15, %cst_6 [1] : vector<3x128xf32> to vector<3xf32>
    %17 = vector.shape_cast %16 : vector<3xf32> to vector<3x1xf32>
    %18 = vector.broadcast %3 : f32 to vector<3x1xf32>
    %19 = arith.mulf %18, %17 : vector<3x1xf32>
    %20 = arith.subf %13, %19 : vector<3x1xf32>
    %21 = vector.broadcast %4 : f32 to vector<3x1xf32>
    %22 = arith.mulf %20, %21 : vector<3x1xf32>
    %cst_7 = arith.constant 0.000000e+00 : f32
    %23 = vector.broadcast %cst_7 : f32 to vector<3x1xf32>
    %24 = arith.cmpf oeq, %13, %23 : vector<3x1xf32>
    %cst_8 = arith.constant 1.000000e+00 : f32
    %cst_9 = arith.constant 0.000000e+00 : f32
    %25 = vector.broadcast %cst_8 : f32 to vector<3x1xf32>
    %26 = vector.broadcast %cst_9 : f32 to vector<3x1xf32>
    %27 = arith.select %24, %25, %26 : vector<3x1xi1>, vector<3x1xf32>
    %28 = vector.shape_cast %27 : vector<3x1xf32> to vector<1x3x1xf32>
    %cst_10 = arith.constant dense<0x7F800000> : vector<1xf32>
    %29 = vector.multi_reduction <minimumf>, %28, %cst_10 [1, 2] : vector<1x3x1xf32> to vector<1xf32>
    %30 = vector.shape_cast %29 : vector<1xf32> to vector<1x1x1xf32>
    %31 = vector.extract %30[0, 0, 0] : f32 from vector<1x1x1xf32>
    %cst_11 = arith.constant 0.000000e+00 : f32
    %32 = arith.cmpf ogt, %31, %cst_11 : f32
    %33 = vector.broadcast %9 : vector<1x128xf32> to vector<3x128xf32>
    %34 = arith.mulf %33, %6 : vector<3x128xf32>
    %cst_12 = arith.constant dense<0.000000e+00> : vector<3xf32>
    %35 = vector.multi_reduction <add>, %34, %cst_12 [1] : vector<3x128xf32> to vector<3xf32>
    %36 = vector.shape_cast %35 : vector<3xf32> to vector<3x1xf32>
    %37 = vector.broadcast %4 : f32 to vector<3x1xf32>
    %38 = arith.mulf %36, %37 : vector<3x1xf32>
    %cst_13 = arith.constant 0.000000e+00 : f32
    %39 = vector.broadcast %cst_13 : f32 to vector<3x1xf32>
    %40 = arith.select %32, %38, %39 : vector<3x1xf32>
    %41 = vector.broadcast %40 : vector<3x1xf32> to vector<3x128xf32>
    %42 = arith.subf %6, %41 : vector<3x128xf32>
    %43 = vector.broadcast %5 : f32 to vector<3x1xf32>
    %44 = arith.mulf %22, %43 : vector<3x1xf32>
    %45 = vector.broadcast %44 : vector<3x1xf32> to vector<3x128xf32>
    %46 = arith.addf %7, %45 : vector<3x128xf32>
    %c0_14 = arith.constant 0 : index
    %c0_15 = arith.constant 0 : index
    %47 = vector.load %arg3[%c0_14, %c0_15] : memref<8x128xf32, #tpu.memory_space<vmem>>, vector<8x128xf32>
    tpu.vector_store %arg3[%c0_14, %c0_15], %0 {strides = array<i32>} : memref<8x128xf32, #tpu.memory_space<vmem>>, vector<8x128xf32>,
    %c0_16 = arith.constant 0 : index
    %c0_17 = arith.constant 0 : index
    %48 = vector.load %arg3[%c0_16, %c0_17] : memref<8x128xf32, #tpu.memory_space<vmem>>, vector<3x128xf32>
    tpu.vector_store %arg3[%c0_16, %c0_17], %42 {strides = array<i32>} : memref<8x128xf32, #tpu.memory_space<vmem>>, vector<3x128xf32>,
    %c3 = arith.constant 3 : index
    %c0_18 = arith.constant 0 : index
    %49 = vector.load %arg3[%c3, %c0_18] : memref<8x128xf32, #tpu.memory_space<vmem>>, vector<3x128xf32>
    tpu.vector_store %arg3[%c3, %c0_18], %46 {strides = array<i32>} : memref<8x128xf32, #tpu.memory_space<vmem>>, vector<3x128xf32>,
    return
  }
}

</mosaic_0001>

<bundles_post_ra>
// kernel: conservation_layer.1
= control target key start
LH: loop header
LB: loop body
LE: loop exit
PB: predicated region body
PF: predicated region fallthrough
CT: control target
= control target key end

     0   :  { %8 = vsyncpa [#allocation3], 0  ;;  %s176_s0 = inlined_call_operand.vmem [shape: f32[2], index: 0, kind: input, shape index: {}]   ;;  %s177_s1 = inlined_call_operand.vmem [shape: f32[8,128], index: 1, kind: input, shape index: {}, may-alias: {1,3}]   ;;  %s178_s2 = inlined_call_operand.vmem [shape: f32[4,128], index: 2, kind: input, shape index: {}]   ;;  %s179_s3 = inlined_call_operand.vmem [shape: f32[8,128], index: 3, kind: output, shape index: {}, may-alias: {1,3}]  }
   0x1   :  { %s15_s14 = sshll.u32 %s176_s0, 4  ;;  %s16_s14 = int_to_ptr.vmem [resolvable:$true] %s15_s14 }
   0x2   :  { %s112_s15 = scalar_lea.vmem %s16_s14, 16  ;;  %p117_p1 = scmp.lt.s32.totalorder %s16_s14, %s16_s14 }
   0x3   :  { %p113_p0 = scmp.ne.s32.totalorder %s16_s14, %s112_s15  ;;  %p118_p2 = scmp.lt.s32.totalorder %s112_s15, %s112_s15 }
   0x5   :  { %p119_p3 = por %p118_p2, %p117_p1 }
   0x7   :  { %p120_p4 = pnand %p119_p3, %p113_p0 }
   0x9   :  { %123 = shalt.err (!%p120_p4)
}
   0xa   :  { %s126_s16 = smov [#allocation2]  }
   0xb   :  { %18 = dma.vmem_to_smem %s16_s14, 16, %s126_s16, [#allocation3]  }
   0xc   :  { %124 = dma.done.wait [#allocation3], 16  }
   0xd   :  { %125 = vsyncadd [#allocation3], 4294967280 }
   0xe   :  { %26 = sfence }
   0xf   :  { %v155_v0 = vld [vmem:[%s177_s1] sm:$0xff]  ;;  %v37_v1 = vlaneseq  ;;  %s29_s20 = sld [smem:[#allocation2]]  ;;  %s96_s21 = sld [smem:[#allocation2 + $0x1]]  ;;  %vm47_vm0 = vcmask 1045507   ;;  %vm42_vm1 = vcmask 1042432   ;;  %v127_v15 = vmov 0  }
  0x10   :  { %88 = vst [vmem:[%s179_s3] sm:$0xff] %v155_v0  ;;  %v28_v3 = vld [vmem:[%s178_s2] sm:$0xf]  ;;  %106 = vset.pattern.permute.xlu1 %v127_v15  ;;  %107 = vset.pattern.permute.xlu0 %v127_v15  ;;  %v128_v22 = vmov 0.0  }
  0x11   :  { %v38_v2 = vshrl.u32 %v37_v1, 7 }
  0x13   :  { %v39_v4 = vsub.s32 3, %v38_v2 }
  0x15   :  { %v40_v5 = vrot.slane %v28_v3, %v39_v4  ;;  %v31_v6 = vstv %s29_s20  ;;  %v34_v7 = vstv %s96_s21 }
  0x16   :  { %108 = vrcp.f32 %v31_v6 }
  0x17   :  { %v46_v8 = vmul.f32 %v40_v5, %v155_v0  ;;  %v41_v9 = vmul.f32 %v40_v5, %v28_v3  ;;  %110 = vrcp.f32 %v34_v7 }
  0x19   :  { %v48_v10 = vsel %vm47_vm0, %v46_v8, 0.0  ;;  %v70_v11 = vsel %vm42_vm1, %v46_v8, 0.0  ;;  %v43_v12 = vsel %vm42_vm1, %v41_v9, 0.0 }
  0x1a   :  { %49 = vadd.xlane.f32.xlu0 %v48_v10  ;;  %71 = vadd.xlane.f32.xlu1 %v70_v11 }
  0x1e   :  { %44 = vadd.xlane.f32.xlu0 %v43_v12 }
  0x20   :  { %v109_v13 = vpop.eup %108 }
  0x21   :  { %v111_v14 = vpop.eup %110  ;;  %97 = vpush %v109_v13 }
  0x22   :  { %99 = vpush %v111_v14 }
  0x52   :  { %s98_s1 = spop %97 }
  0x53   :  { %s100_s2 = spop %99  ;;  %v57_v20 = vstv %s98_s1 }
  0x54   :  { %v79_v24 = vstv %s100_s2 }
  0xa7   :  { %v50_v16 = vpop.xlane.xlu0 %49  ;;  %v72_v34 = vpop.xlane.xlu1 %71 }
  0xa8   :  { %v52_v17 = vmul.f32 %v50_v16, %v34_v7  ;;  %v73_v35 = vmul.f32 %v72_v34, %v57_v20 }
  0xaa   :  { %v54_v18 = vrot.slane %v52_v17, 3 }
  0xab   :  { %v45_v19 = vpop.xlane.xlu0 %44 }
  0xac   :  { %v56_v21 = vsub.f32 %v45_v19, %v54_v18  ;;  %vm59_vm2 = vcmp.eq.f32.partialorder %v45_v19, 0.0 }
  0xad   :  { %v60_v23 = vsel %vm59_vm2, 1.0, %v128_v22 }
  0xae   :  { %v61_v25 = vsel %vm42_vm1, %v60_v23, inf  ;;  %v58_v26 = vmul.f32 %v57_v20, %v56_v21 }
  0xaf   :  { %v62_v27 = vrot.slane %v61_v25, 4 }
  0xb0   :  { %v80_v28 = vmul.f32 %v79_v24, %v58_v26 }
  0xb1   :  { %v63_v29 = vmin.f32 %v61_v25, %v62_v27 }
  0xb2   :  { %83 = vperm.xlu1 %106, %v80_v28  }
  0xb3   :  { %v64_v30 = vrot.slane %v63_v29, 2 }
  0xb5   :  { %v65_v31 = vmin.f32 %v63_v29, %v64_v30 }
  0xb7   :  { %v66_v32 = vrot.slane %v65_v31, 1 }
  0xb9   :  { %v67_v33 = vmin.f32 %v65_v31, %v66_v32 }
  0xbb   :  { %101 = vpush %v67_v33 }
  0xec   :  { %s102_s24 = spop %101 }
  0xed   :  { %p69_p5 = scmp.gt.f32.partialorder %s102_s24, 0.0 }
  0xef   :  { %s74_s25 = scalar_select %p69_p5, 1, 0 }
  0xf1   :  { %v75_v36 = vstv %s74_s25 }
  0xf2   :  { %vm76_vm3 = vcmp.eq.s32.totalorder %v75_v36, 1 }
  0xf3   :  { %v77_v37 = vsel %vm76_vm3, %v73_v35, 0.0 }
  0xf4   :  { %v78_v38 = vsub.f32 %v155_v0, %v77_v37 }
  0xf6   :  { %89 = vst [vmem:[%s179_s3] sm:$0x7] %v78_v38 }
 0x131   :  { %v84_v39 = vpop.permute.xlu1 %83 }
 0x132   :  { %v85_v40 = vrot.slane %v84_v39, 5 }
 0x134   :  { %v87_v41 = vadd.f32 %v85_v40, %v155_v0 }
 0x136   :  { %90 = vst [vmem:[%s179_s3] sm:$0x38] %v87_v41 }
 0x137   :  { %95 = vsyncpa [#allocation3], 1 }

</bundles_post_ra>
